<compile_context>
chip_gen: v5e
topology: v5e:2x2
jax: 0.10.0
libtpu: 0.0.40
codegen_flags: <defaults>
</compile_context>

<pallas_src>
import jax
import jax.numpy as jnp
from jax.experimental import pallas as pl
from jax.experimental.pallas import tpu as pltpu


# ----------------------------------------------------------------------------
# helpers
# ----------------------------------------------------------------------------
def _pad_to(a, shape):
    """Zero-pad array `a` up to `shape` (no dim may shrink)."""
    pads = [(0, s - d) for d, s in zip(a.shape, shape)]
    return jnp.pad(a, pads)


# ----------------------------------------------------------------------------
# fused kernel factory: feature extractor + all residual blocks in one kernel
# ----------------------------------------------------------------------------
def _make_fused_kernel(N, L, CP, kernel_size, block_meta):
    """block_meta: tuple of (dilation, has_downsample) per residual block."""
    K = kernel_size
    M = N * L  # batch folded into the matmul M dimension

    def kernel(*refs):
        x_ref, few_ref, feb_ref = refs[0], refs[1], refs[2]
        o_ref = refs[-1]
        widx = 3

        # ---- frozen feature extractor: flatten + linear (bf16 in, f32 acc)
        h = jnp.dot(x_ref[...], few_ref[...],
                    preferred_element_type=jnp.float32) + feb_ref[...]  # (M, CP)

        # ---- within-sequence time index, hoisted once (power-of-two fast path)
        row = jax.lax.broadcasted_iota(jnp.int32, (M, 1), 0)
        if L & (L - 1) == 0:
            t_in_seq = jnp.bitwise_and(row, L - 1)
        else:
            t_in_seq = jax.lax.rem(row, jnp.int32(L))

        def causal_conv(inp, w_ref, b_ref, dilation):
            # inp: (M, CP) f32 with batch folded into rows.  The causal shift
            # out[t] = in[t - off] is a sublane roll + mask; masking the first
            # `off` rows of every sequence also zeroes cross-batch wrap-around.
            acc = jnp.zeros((M, CP), jnp.float32)
            for k in range(K):
                off = (K - 1 - k) * dilation
                if off >= L:
                    continue  # tap lies entirely in the zero-padding region
                if off == 0:
                    xs = inp
                else:
                    rolled = pltpu.roll(inp, shift=off, axis=0)
                    xs = jnp.where(t_in_seq >= off, rolled, 0.0)
                acc = acc + jnp.dot(xs.astype(jnp.bfloat16), w_ref[k],
                                    preferred_element_type=jnp.float32)
            return acc + b_ref[...]

        # ---- residual blocks (static Python loop, unrolled at trace time)
        for dilation, has_ds in block_meta:
            w1, b1, w2, b2 = refs[widx:widx + 4]
            widx += 4
            if has_ds:
                wr, br = refs[widx:widx + 2]
                widx += 2
                res = jnp.dot(h.astype(jnp.bfloat16), wr[...],
                              preferred_element_type=jnp.float32) + br[...]
            else:
                res = h  # nn.Identity residual: skip the 1x1 matmul entirely

            a = jnp.maximum(causal_conv(h, w1, b1, dilation), 0.0)
            # dropout -> identity (eval mode)
            a = jnp.maximum(causal_conv(a, w2, b2, dilation), 0.0)
            # dropout -> identity (eval mode)
            h = a + res

        o_ref[...] = h  # (M, CP) f32 — 128-lane-dense (unmasked) store

    return kernel


# ----------------------------------------------------------------------------
# TCNWrapper forward (single fused Pallas call)
# ----------------------------------------------------------------------------
def tcn_wrapper_forward(x, fe_w, fe_b, blocks, input_shape="NLC"):
    """x: (N, L, C, H, W) float32; returns PyTorch-layout (N, C_out, L)."""
    if input_shape != "NLC":
        # TODO(synk): 'NCL' path (feeds (N, L, F) straight to Conv1d, i.e.
        # channels = frame count) is not wired into the fused kernel.
        raise NotImplementedError("only input_shape='NLC' is implemented")

    N, L = x.shape[0], x.shape[1]
    Kd = x.shape[2] * x.shape[3] * x.shape[4]
    F = fe_w.shape[-1]
    K = blocks[0]["w1"].shape[0]
    c_last = blocks[-1]["w2"].shape[-1]

    # pad every channel dimension to a multiple of 128 (lane-dense matmuls and
    # stores; zero-padded weights/biases keep the valid channels exact and the
    # padded channels identically zero through the whole network).
    max_c = max([F] + [b["w1"].shape[-1] for b in blocks])
    CP = ((max_c + 127) // 128) * 128

    x_flat = x.reshape(N * L, Kd).astype(jnp.bfloat16)
    args = [
        x_flat,
        _pad_to(fe_w, (Kd, CP)).astype(jnp.bfloat16),
        _pad_to(fe_b, (1, CP)).astype(jnp.float32),
    ]
    block_meta = []
    for blk in blocks:
        args += [
            _pad_to(blk["w1"], (K, CP, CP)).astype(jnp.bfloat16),
            _pad_to(blk["b1"], (1, CP)).astype(jnp.float32),
            _pad_to(blk["w2"], (K, CP, CP)).astype(jnp.bfloat16),
            _pad_to(blk["b2"], (1, CP)).astype(jnp.float32),
        ]
        has_ds = blk["wr"] is not None
        if has_ds:
            args += [
                _pad_to(blk["wr"], (CP, CP)).astype(jnp.bfloat16),
                _pad_to(blk["br"], (1, CP)).astype(jnp.float32),
            ]
        block_meta.append((int(blk["dilation"]), has_ds))

    kernel = _make_fused_kernel(N, L, CP, K, tuple(block_meta))
    out_padded = pl.pallas_call(
        kernel,
        out_shape=jax.ShapeDtypeStruct((N * L, CP), jnp.float32),
        in_specs=[pl.BlockSpec(memory_space=pltpu.MemorySpace.VMEM)
                  for _ in args],
        out_specs=pl.BlockSpec(memory_space=pltpu.MemorySpace.VMEM),
    )(*args)

    # drop channel padding, back to PyTorch NCL layout (N, channels, length)
    out = out_padded.reshape(N, L, CP)[:, :, :c_last]
    return jnp.transpose(out, (0, 2, 1))


# ----------------------------------------------------------------------------
# Pure-JAX reference (same bf16-operand / f32-accumulate math)
# ----------------------------------------------------------------------------
def _ref_causal_conv(x_nlc, w, b, dilation):
    N, L, _ = x_nlc.shape
    K = w.shape[0]
    pad = (K - 1) * dilation
    xp = jnp.pad(x_nlc, ((0, 0), (pad, 0), (0, 0)))
    out = jnp.zeros((N, L, w.shape[-1]), jnp.float32)
    for k in range(K):
        xs = xp[:, k * dilation:k * dilation + L, :].astype(jnp.bfloat16)
        out = out + jnp.einsum("nlc,cd->nld", xs, w[k].astype(jnp.bfloat16),
                               preferred_element_type=jnp.float32)
    return out + b


def ref_forward(x, fe_w, fe_b, blocks):
    N, L = x.shape[0], x.shape[1]
    x_flat = x.reshape(N * L, -1).astype(jnp.bfloat16)
    feats = jnp.dot(x_flat, fe_w.astype(jnp.bfloat16),
                    preferred_element_type=jnp.float32) + fe_b
    h = feats.reshape(N, L, -1)
    for blk in blocks:
        if blk["wr"] is not None:
            res = jnp.einsum("nlc,cd->nld", h.astype(jnp.bfloat16),
                             blk["wr"].astype(jnp.bfloat16),
                             preferred_element_type=jnp.float32) + blk["br"]
        else:
            res = h
        a = jnp.maximum(_ref_causal_conv(h, blk["w1"], blk["b1"],
                                         blk["dilation"]), 0.0)
        a = jnp.maximum(_ref_causal_conv(a, blk["w2"], blk["b2"],
                                         blk["dilation"]), 0.0)
        h = a + res
    return jnp.transpose(h, (0, 2, 1))


# ----------------------------------------------------------------------------
# Deterministic parameter construction + run
# ----------------------------------------------------------------------------
if __name__ == "__main__":
    key = jax.random.PRNGKey(0)
    keys = jax.random.split(key, 20)

    # shapes: batch=2, frames(seq)=8, image C,H,W = 3,8,8 ; feature_dim=32
    N, L, C, H, W = 2, 8, 3, 8, 8
    F = 32
    num_channels = [16, 16]
    K = 3  # kernel_size

    x = jax.random.normal(keys[0], (N, L, C, H, W), jnp.float32)

    # frozen feature extractor: flatten + linear
    fe_w = 0.05 * jax.random.normal(keys[1], (C * H * W, F), jnp.float32)
    fe_b = 0.05 * jax.random.normal(keys[2], (1, F), jnp.float32)

    # TCN residual-block params (PyTorch Conv1d weight (Cout,Cin,K) stored
    # pre-transposed as (K, Cin, Cout) for matmul-per-tap form)
    blocks = []
    in_ch = F
    ki = 3
    for i, out_ch in enumerate(num_channels):
        dilation = 2 ** i
        w1 = 0.1 * jax.random.normal(keys[ki], (K, in_ch, out_ch), jnp.float32); ki += 1
        b1 = 0.1 * jax.random.normal(keys[ki], (1, out_ch), jnp.float32); ki += 1
        w2 = 0.1 * jax.random.normal(keys[ki], (K, out_ch, out_ch), jnp.float32); ki += 1
        b2 = 0.1 * jax.random.normal(keys[ki], (1, out_ch), jnp.float32); ki += 1
        if in_ch != out_ch:
            wr = 0.1 * jax.random.normal(keys[ki], (in_ch, out_ch), jnp.float32); ki += 1
            br = 0.1 * jax.random.normal(keys[ki], (1, out_ch), jnp.float32); ki += 1
        else:
            wr, br = None, None  # nn.Identity residual
        blocks.append(dict(w1=w1, b1=b1, w2=w2, b2=b2, wr=wr, br=br,
                           dilation=dilation))
        in_ch = out_ch

    out = jax.block_until_ready(
        tcn_wrapper_forward(x, fe_w, fe_b, blocks, input_shape="NLC"))
    ref = jax.block_until_ready(ref_forward(x, fe_w, fe_b, blocks))

    assert out.shape == (N, num_channels[-1], L), out.shape
    err = float(jnp.abs(out - ref).max())
    assert jnp.allclose(out, ref, atol=2e-3, rtol=2e-3), err
    print("KERNEL_OK")
</pallas_src>

<mosaic_0001>
module attributes {stable_mosaic.version = 11 : i64} {
  func.func @kernel(%arg0: memref<16x192xbf16, #tpu.memory_space<vmem>>, %arg1: memref<192x128xbf16, #tpu.memory_space<vmem>>, %arg2: memref<1x128xf32, #tpu.memory_space<vmem>>, %arg3: memref<3x128x128xbf16, #tpu.memory_space<vmem>>, %arg4: memref<1x128xf32, #tpu.memory_space<vmem>>, %arg5: memref<3x128x128xbf16, #tpu.memory_space<vmem>>, %arg6: memref<1x128xf32, #tpu.memory_space<vmem>>, %arg7: memref<128x128xbf16, #tpu.memory_space<vmem>>, %arg8: memref<1x128xf32, #tpu.memory_space<vmem>>, %arg9: memref<3x128x128xbf16, #tpu.memory_space<vmem>>, %arg10: memref<1x128xf32, #tpu.memory_space<vmem>>, %arg11: memref<3x128x128xbf16, #tpu.memory_space<vmem>>, %arg12: memref<1x128xf32, #tpu.memory_space<vmem>>, %arg13: memref<16x128xf32, #tpu.memory_space<vmem>>) attributes {dimension_semantics = [], scalar_prefetch = 0 : i64, scratch_operands = 0 : i64, tpu.core_type = #tpu.core_type<tc>} {
    %c0 = arith.constant 0 : index
    %c0_0 = arith.constant 0 : index
    %0 = vector.load %arg0[%c0, %c0_0] : memref<16x192xbf16, #tpu.memory_space<vmem>>, vector<16x192xbf16>
    %c0_1 = arith.constant 0 : index
    %c0_2 = arith.constant 0 : index
    %1 = vector.load %arg1[%c0_1, %c0_2] : memref<192x128xbf16, #tpu.memory_space<vmem>>, vector<192x128xbf16>
    %cst = arith.constant dense<0.000000e+00> : vector<16x128xf32>
    %2 = tpu.matmul %0, %1, %cst {dimension_numbers = #tpu.dot_dimension_numbers<[1], [0], [0], [1], [0, 0, 1, 1], [], []>} : vector<16x192xbf16>, vector<192x128xbf16>, vector<16x128xf32> -> vector<16x128xf32>
    %c0_3 = arith.constant 0 : index
    %c0_4 = arith.constant 0 : index
    %3 = vector.load %arg2[%c0_3, %c0_4] : memref<1x128xf32, #tpu.memory_space<vmem>>, vector<1x128xf32>
    %4 = vector.broadcast %3 : vector<1x128xf32> to vector<16x128xf32>
    %5 = arith.addf %2, %4 : vector<16x128xf32>
    %6 = tpu.iota {dimensions = array<i32: 0>} : vector<16x1xi32>
    %c7_i32 = arith.constant 7 : i32
    %7 = vector.broadcast %c7_i32 : i32 to vector<16x1xi32>
    %8 = arith.andi %6, %7 : vector<16x1xi32>
    %9 = arith.truncf %5 : vector<16x128xf32> to vector<16x128xbf16>
    %c0_5 = arith.constant 0 : index
    %c0_6 = arith.constant 0 : index
    %10 = vector.load %arg7[%c0_5, %c0_6] : memref<128x128xbf16, #tpu.memory_space<vmem>>, vector<128x128xbf16>
    %cst_7 = arith.constant dense<0.000000e+00> : vector<16x128xf32>
    %11 = tpu.matmul %9, %10, %cst_7 {dimension_numbers = #tpu.dot_dimension_numbers<[1], [0], [0], [1], [0, 0, 1, 1], [], []>} : vector<16x128xbf16>, vector<128x128xbf16>, vector<16x128xf32> -> vector<16x128xf32>
    %c0_8 = arith.constant 0 : index
    %c0_9 = arith.constant 0 : index
    %12 = vector.load %arg8[%c0_8, %c0_9] : memref<1x128xf32, #tpu.memory_space<vmem>>, vector<1x128xf32>
    %13 = vector.broadcast %12 : vector<1x128xf32> to vector<16x128xf32>
    %14 = arith.addf %11, %13 : vector<16x128xf32>
    %cst_10 = arith.constant 0.000000e+00 : f32
    %15 = vector.broadcast %cst_10 : f32 to vector<16x128xf32>
    %c2_i32 = arith.constant 2 : i32
    %16 = tpu.dynamic_rotate %5 by %c2_i32 dim 0 : vector<16x128xf32>, i32 -> vector<16x128xf32>
    %c2_i32_11 = arith.constant 2 : i32
    %17 = vector.broadcast %c2_i32_11 : i32 to vector<16x1xi32>
    %18 = arith.cmpi sge, %8, %17 : vector<16x1xi32>
    %cst_12 = arith.constant 0.000000e+00 : f32
    %19 = vector.shape_cast %18 : vector<16x1xi1> to vector<16x1xi1>
    %20 = vector.broadcast %19 : vector<16x1xi1> to vector<16x128xi1>
    %21 = vector.broadcast %cst_12 : f32 to vector<16x128xf32>
    %22 = arith.select %20, %16, %21 : vector<16x128xi1>, vector<16x128xf32>
    %23 = arith.truncf %22 : vector<16x128xf32> to vector<16x128xbf16>
    %c0_13 = arith.constant 0 : index
    %c0_14 = arith.constant 0 : index
    %c0_15 = arith.constant 0 : index
    %24 = vector.load %arg3[%c0_13, %c0_14, %c0_15] : memref<3x128x128xbf16, #tpu.memory_space<vmem>>, vector<1x128x128xbf16>
    %25 = vector.shape_cast %24 : vector<1x128x128xbf16> to vector<128x128xbf16>
    %cst_16 = arith.constant dense<0.000000e+00> : vector<16x128xf32>
    %26 = tpu.matmul %23, %25, %cst_16 {dimension_numbers = #tpu.dot_dimension_numbers<[1], [0], [0], [1], [0, 0, 1, 1], [], []>} : vector<16x128xbf16>, vector<128x128xbf16>, vector<16x128xf32> -> vector<16x128xf32>
    %27 = arith.addf %15, %26 : vector<16x128xf32>
    %c1_i32 = arith.constant 1 : i32
    %28 = tpu.dynamic_rotate %5 by %c1_i32 dim 0 : vector<16x128xf32>, i32 -> vector<16x128xf32>
    %c1_i32_17 = arith.constant 1 : i32
    %29 = vector.broadcast %c1_i32_17 : i32 to vector<16x1xi32>
    %30 = arith.cmpi sge, %8, %29 : vector<16x1xi32>
    %cst_18 = arith.constant 0.000000e+00 : f32
    %31 = vector.shape_cast %30 : vector<16x1xi1> to vector<16x1xi1>
    %32 = vector.broadcast %31 : vector<16x1xi1> to vector<16x128xi1>
    %33 = vector.broadcast %cst_18 : f32 to vector<16x128xf32>
    %34 = arith.select %32, %28, %33 : vector<16x128xi1>, vector<16x128xf32>
    %35 = arith.truncf %34 : vector<16x128xf32> to vector<16x128xbf16>
    %c1 = arith.constant 1 : index
    %c0_19 = arith.constant 0 : index
    %c0_20 = arith.constant 0 : index
    %36 = vector.load %arg3[%c1, %c0_19, %c0_20] : memref<3x128x128xbf16, #tpu.memory_space<vmem>>, vector<1x128x128xbf16>
    %37 = vector.shape_cast %36 : vector<1x128x128xbf16> to vector<128x128xbf16>
    %cst_21 = arith.constant dense<0.000000e+00> : vector<16x128xf32>
    %38 = tpu.matmul %35, %37, %cst_21 {dimension_numbers = #tpu.dot_dimension_numbers<[1], [0], [0], [1], [0, 0, 1, 1], [], []>} : vector<16x128xbf16>, vector<128x128xbf16>, vector<16x128xf32> -> vector<16x128xf32>
    %39 = arith.addf %27, %38 : vector<16x128xf32>
    %40 = arith.truncf %5 : vector<16x128xf32> to vector<16x128xbf16>
    %c2 = arith.constant 2 : index
    %c0_22 = arith.constant 0 : index
    %c0_23 = arith.constant 0 : index
    %41 = vector.load %arg3[%c2, %c0_22, %c0_23] : memref<3x128x128xbf16, #tpu.memory_space<vmem>>, vector<1x128x128xbf16>
    %42 = vector.shape_cast %41 : vector<1x128x128xbf16> to vector<128x128xbf16>
    %cst_24 = arith.constant dense<0.000000e+00> : vector<16x128xf32>
    %43 = tpu.matmul %40, %42, %cst_24 {dimension_numbers = #tpu.dot_dimension_numbers<[1], [0], [0], [1], [0, 0, 1, 1], [], []>} : vector<16x128xbf16>, vector<128x128xbf16>, vector<16x128xf32> -> vector<16x128xf32>
    %44 = arith.addf %39, %43 : vector<16x128xf32>
    %c0_25 = arith.constant 0 : index
    %c0_26 = arith.constant 0 : index
    %45 = vector.load %arg4[%c0_25, %c0_26] : memref<1x128xf32, #tpu.memory_space<vmem>>, vector<1x128xf32>
    %46 = vector.broadcast %45 : vector<1x128xf32> to vector<16x128xf32>
    %47 = arith.addf %44, %46 : vector<16x128xf32>
    %cst_27 = arith.constant 0.000000e+00 : f32
    %48 = vector.broadcast %cst_27 : f32 to vector<16x128xf32>
    %49 = arith.maximumf %47, %48 : vector<16x128xf32>
    %cst_28 = arith.constant 0.000000e+00 : f32
    %50 = vector.broadcast %cst_28 : f32 to vector<16x128xf32>
    %c2_i32_29 = arith.constant 2 : i32
    %51 = tpu.dynamic_rotate %49 by %c2_i32_29 dim 0 : vector<16x128xf32>, i32 -> vector<16x128xf32>
    %c2_i32_30 = arith.constant 2 : i32
    %52 = vector.broadcast %c2_i32_30 : i32 to vector<16x1xi32>
    %53 = arith.cmpi sge, %8, %52 : vector<16x1xi32>
    %cst_31 = arith.constant 0.000000e+00 : f32
    %54 = vector.shape_cast %53 : vector<16x1xi1> to vector<16x1xi1>
    %55 = vector.broadcast %54 : vector<16x1xi1> to vector<16x128xi1>
    %56 = vector.broadcast %cst_31 : f32 to vector<16x128xf32>
    %57 = arith.select %55, %51, %56 : vector<16x128xi1>, vector<16x128xf32>
    %58 = arith.truncf %57 : vector<16x128xf32> to vector<16x128xbf16>
    %c0_32 = arith.constant 0 : index
    %c0_33 = arith.constant 0 : index
    %c0_34 = arith.constant 0 : index
    %59 = vector.load %arg5[%c0_32, %c0_33, %c0_34] : memref<3x128x128xbf16, #tpu.memory_space<vmem>>, vector<1x128x128xbf16>
    %60 = vector.shape_cast %59 : vector<1x128x128xbf16> to vector<128x128xbf16>
    %cst_35 = arith.constant dense<0.000000e+00> : vector<16x128xf32>
    %61 = tpu.matmul %58, %60, %cst_35 {dimension_numbers = #tpu.dot_dimension_numbers<[1], [0], [0], [1], [0, 0, 1, 1], [], []>} : vector<16x128xbf16>, vector<128x128xbf16>, vector<16x128xf32> -> vector<16x128xf32>
    %62 = arith.addf %50, %61 : vector<16x128xf32>
    %c1_i32_36 = arith.constant 1 : i32
    %63 = tpu.dynamic_rotate %49 by %c1_i32_36 dim 0 : vector<16x128xf32>, i32 -> vector<16x128xf32>
    %c1_i32_37 = arith.constant 1 : i32
    %64 = vector.broadcast %c1_i32_37 : i32 to vector<16x1xi32>
    %65 = arith.cmpi sge, %8, %64 : vector<16x1xi32>
    %cst_38 = arith.constant 0.000000e+00 : f32
    %66 = vector.shape_cast %65 : vector<16x1xi1> to vector<16x1xi1>
    %67 = vector.broadcast %66 : vector<16x1xi1> to vector<16x128xi1>
    %68 = vector.broadcast %cst_38 : f32 to vector<16x128xf32>
    %69 = arith.select %67, %63, %68 : vector<16x128xi1>, vector<16x128xf32>
    %70 = arith.truncf %69 : vector<16x128xf32> to vector<16x128xbf16>
    %c1_39 = arith.constant 1 : index
    %c0_40 = arith.constant 0 : index
    %c0_41 = arith.constant 0 : index
    %71 = vector.load %arg5[%c1_39, %c0_40, %c0_41] : memref<3x128x128xbf16, #tpu.memory_space<vmem>>, vector<1x128x128xbf16>
    %72 = vector.shape_cast %71 : vector<1x128x128xbf16> to vector<128x128xbf16>
    %cst_42 = arith.constant dense<0.000000e+00> : vector<16x128xf32>
    %73 = tpu.matmul %70, %72, %cst_42 {dimension_numbers = #tpu.dot_dimension_numbers<[1], [0], [0], [1], [0, 0, 1, 1], [], []>} : vector<16x128xbf16>, vector<128x128xbf16>, vector<16x128xf32> -> vector<16x128xf32>
    %74 = arith.addf %62, %73 : vector<16x128xf32>
    %75 = arith.truncf %49 : vector<16x128xf32> to vector<16x128xbf16>
    %c2_43 = arith.constant 2 : index
    %c0_44 = arith.constant 0 : index
    %c0_45 = arith.constant 0 : index
    %76 = vector.load %arg5[%c2_43, %c0_44, %c0_45] : memref<3x128x128xbf16, #tpu.memory_space<vmem>>, vector<1x128x128xbf16>
    %77 = vector.shape_cast %76 : vector<1x128x128xbf16> to vector<128x128xbf16>
    %cst_46 = arith.constant dense<0.000000e+00> : vector<16x128xf32>
    %78 = tpu.matmul %75, %77, %cst_46 {dimension_numbers = #tpu.dot_dimension_numbers<[1], [0], [0], [1], [0, 0, 1, 1], [], []>} : vector<16x128xbf16>, vector<128x128xbf16>, vector<16x128xf32> -> vector<16x128xf32>
    %79 = arith.addf %74, %78 : vector<16x128xf32>
    %c0_47 = arith.constant 0 : index
    %c0_48 = arith.constant 0 : index
    %80 = vector.load %arg6[%c0_47, %c0_48] : memref<1x128xf32, #tpu.memory_space<vmem>>, vector<1x128xf32>
    %81 = vector.broadcast %80 : vector<1x128xf32> to vector<16x128xf32>
    %82 = arith.addf %79, %81 : vector<16x128xf32>
    %cst_49 = arith.constant 0.000000e+00 : f32
    %83 = vector.broadcast %cst_49 : f32 to vector<16x128xf32>
    %84 = arith.maximumf %82, %83 : vector<16x128xf32>
    %85 = arith.addf %84, %14 : vector<16x128xf32>
    %cst_50 = arith.constant 0.000000e+00 : f32
    %86 = vector.broadcast %cst_50 : f32 to vector<16x128xf32>
    %c4_i32 = arith.constant 4 : i32
    %87 = tpu.dynamic_rotate %85 by %c4_i32 dim 0 : vector<16x128xf32>, i32 -> vector<16x128xf32>
    %c4_i32_51 = arith.constant 4 : i32
    %88 = vector.broadcast %c4_i32_51 : i32 to vector<16x1xi32>
    %89 = arith.cmpi sge, %8, %88 : vector<16x1xi32>
    %cst_52 = arith.constant 0.000000e+00 : f32
    %90 = vector.shape_cast %89 : vector<16x1xi1> to vector<16x1xi1>
    %91 = vector.broadcast %90 : vector<16x1xi1> to vector<16x128xi1>
    %92 = vector.broadcast %cst_52 : f32 to vector<16x128xf32>
    %93 = arith.select %91, %87, %92 : vector<16x128xi1>, vector<16x128xf32>
    %94 = arith.truncf %93 : vector<16x128xf32> to vector<16x128xbf16>
    %c0_53 = arith.constant 0 : index
    %c0_54 = arith.constant 0 : index
    %c0_55 = arith.constant 0 : index
    %95 = vector.load %arg9[%c0_53, %c0_54, %c0_55] : memref<3x128x128xbf16, #tpu.memory_space<vmem>>, vector<1x128x128xbf16>
    %96 = vector.shape_cast %95 : vector<1x128x128xbf16> to vector<128x128xbf16>
    %cst_56 = arith.constant dense<0.000000e+00> : vector<16x128xf32>
    %97 = tpu.matmul %94, %96, %cst_56 {dimension_numbers = #tpu.dot_dimension_numbers<[1], [0], [0], [1], [0, 0, 1, 1], [], []>} : vector<16x128xbf16>, vector<128x128xbf16>, vector<16x128xf32> -> vector<16x128xf32>
    %98 = arith.addf %86, %97 : vector<16x128xf32>
    %c2_i32_57 = arith.constant 2 : i32
    %99 = tpu.dynamic_rotate %85 by %c2_i32_57 dim 0 : vector<16x128xf32>, i32 -> vector<16x128xf32>
    %c2_i32_58 = arith.constant 2 : i32
    %100 = vector.broadcast %c2_i32_58 : i32 to vector<16x1xi32>
    %101 = arith.cmpi sge, %8, %100 : vector<16x1xi32>
    %cst_59 = arith.constant 0.000000e+00 : f32
    %102 = vector.shape_cast %101 : vector<16x1xi1> to vector<16x1xi1>
    %103 = vector.broadcast %102 : vector<16x1xi1> to vector<16x128xi1>
    %104 = vector.broadcast %cst_59 : f32 to vector<16x128xf32>
    %105 = arith.select %103, %99, %104 : vector<16x128xi1>, vector<16x128xf32>
    %106 = arith.truncf %105 : vector<16x128xf32> to vector<16x128xbf16>
    %c1_60 = arith.constant 1 : index
    %c0_61 = arith.constant 0 : index
    %c0_62 = arith.constant 0 : index
    %107 = vector.load %arg9[%c1_60, %c0_61, %c0_62] : memref<3x128x128xbf16, #tpu.memory_space<vmem>>, vector<1x128x128xbf16>
    %108 = vector.shape_cast %107 : vector<1x128x128xbf16> to vector<128x128xbf16>
    %cst_63 = arith.constant dense<0.000000e+00> : vector<16x128xf32>
    %109 = tpu.matmul %106, %108, %cst_63 {dimension_numbers = #tpu.dot_dimension_numbers<[1], [0], [0], [1], [0, 0, 1, 1], [], []>} : vector<16x128xbf16>, vector<128x128xbf16>, vector<16x128xf32> -> vector<16x128xf32>
    %110 = arith.addf %98, %109 : vector<16x128xf32>
    %111 = arith.truncf %85 : vector<16x128xf32> to vector<16x128xbf16>
    %c2_64 = arith.constant 2 : index
    %c0_65 = arith.constant 0 : index
    %c0_66 = arith.constant 0 : index
    %112 = vector.load %arg9[%c2_64, %c0_65, %c0_66] : memref<3x128x128xbf16, #tpu.memory_space<vmem>>, vector<1x128x128xbf16>
    %113 = vector.shape_cast %112 : vector<1x128x128xbf16> to vector<128x128xbf16>
    %cst_67 = arith.constant dense<0.000000e+00> : vector<16x128xf32>
    %114 = tpu.matmul %111, %113, %cst_67 {dimension_numbers = #tpu.dot_dimension_numbers<[1], [0], [0], [1], [0, 0, 1, 1], [], []>} : vector<16x128xbf16>, vector<128x128xbf16>, vector<16x128xf32> -> vector<16x128xf32>
    %115 = arith.addf %110, %114 : vector<16x128xf32>
    %c0_68 = arith.constant 0 : index
    %c0_69 = arith.constant 0 : index
    %116 = vector.load %arg10[%c0_68, %c0_69] : memref<1x128xf32, #tpu.memory_space<vmem>>, vector<1x128xf32>
    %117 = vector.broadcast %116 : vector<1x128xf32> to vector<16x128xf32>
    %118 = arith.addf %115, %117 : vector<16x128xf32>
    %cst_70 = arith.constant 0.000000e+00 : f32
    %119 = vector.broadcast %cst_70 : f32 to vector<16x128xf32>
    %120 = arith.maximumf %118, %119 : vector<16x128xf32>
    %cst_71 = arith.constant 0.000000e+00 : f32
    %121 = vector.broadcast %cst_71 : f32 to vector<16x128xf32>
    %c4_i32_72 = arith.constant 4 : i32
    %122 = tpu.dynamic_rotate %120 by %c4_i32_72 dim 0 : vector<16x128xf32>, i32 -> vector<16x128xf32>
    %c4_i32_73 = arith.constant 4 : i32
    %123 = vector.broadcast %c4_i32_73 : i32 to vector<16x1xi32>
    %124 = arith.cmpi sge, %8, %123 : vector<16x1xi32>
    %cst_74 = arith.constant 0.000000e+00 : f32
    %125 = vector.shape_cast %124 : vector<16x1xi1> to vector<16x1xi1>
    %126 = vector.broadcast %125 : vector<16x1xi1> to vector<16x128xi1>
    %127 = vector.broadcast %cst_74 : f32 to vector<16x128xf32>
    %128 = arith.select %126, %122, %127 : vector<16x128xi1>, vector<16x128xf32>
    %129 = arith.truncf %128 : vector<16x128xf32> to vector<16x128xbf16>
    %c0_75 = arith.constant 0 : index
    %c0_76 = arith.constant 0 : index
    %c0_77 = arith.constant 0 : index
    %130 = vector.load %arg11[%c0_75, %c0_76, %c0_77] : memref<3x128x128xbf16, #tpu.memory_space<vmem>>, vector<1x128x128xbf16>
    %131 = vector.shape_cast %130 : vector<1x128x128xbf16> to vector<128x128xbf16>
    %cst_78 = arith.constant dense<0.000000e+00> : vector<16x128xf32>
    %132 = tpu.matmul %129, %131, %cst_78 {dimension_numbers = #tpu.dot_dimension_numbers<[1], [0], [0], [1], [0, 0, 1, 1], [], []>} : vector<16x128xbf16>, vector<128x128xbf16>, vector<16x128xf32> -> vector<16x128xf32>
    %133 = arith.addf %121, %132 : vector<16x128xf32>
    %c2_i32_79 = arith.constant 2 : i32
    %134 = tpu.dynamic_rotate %120 by %c2_i32_79 dim 0 : vector<16x128xf32>, i32 -> vector<16x128xf32>
    %c2_i32_80 = arith.constant 2 : i32
    %135 = vector.broadcast %c2_i32_80 : i32 to vector<16x1xi32>
    %136 = arith.cmpi sge, %8, %135 : vector<16x1xi32>
    %cst_81 = arith.constant 0.000000e+00 : f32
    %137 = vector.shape_cast %136 : vector<16x1xi1> to vector<16x1xi1>
    %138 = vector.broadcast %137 : vector<16x1xi1> to vector<16x128xi1>
    %139 = vector.broadcast %cst_81 : f32 to vector<16x128xf32>
    %140 = arith.select %138, %134, %139 : vector<16x128xi1>, vector<16x128xf32>
    %141 = arith.truncf %140 : vector<16x128xf32> to vector<16x128xbf16>
    %c1_82 = arith.constant 1 : index
    %c0_83 = arith.constant 0 : index
    %c0_84 = arith.constant 0 : index
    %142 = vector.load %arg11[%c1_82, %c0_83, %c0_84] : memref<3x128x128xbf16, #tpu.memory_space<vmem>>, vector<1x128x128xbf16>
    %143 = vector.shape_cast %142 : vector<1x128x128xbf16> to vector<128x128xbf16>
    %cst_85 = arith.constant dense<0.000000e+00> : vector<16x128xf32>
    %144 = tpu.matmul %141, %143, %cst_85 {dimension_numbers = #tpu.dot_dimension_numbers<[1], [0], [0], [1], [0, 0, 1, 1], [], []>} : vector<16x128xbf16>, vector<128x128xbf16>, vector<16x128xf32> -> vector<16x128xf32>
    %145 = arith.addf %133, %144 : vector<16x128xf32>
    %146 = arith.truncf %120 : vector<16x128xf32> to vector<16x128xbf16>
    %c2_86 = arith.constant 2 : index
    %c0_87 = arith.constant 0 : index
    %c0_88 = arith.constant 0 : index
    %147 = vector.load %arg11[%c2_86, %c0_87, %c0_88] : memref<3x128x128xbf16, #tpu.memory_space<vmem>>, vector<1x128x128xbf16>
    %148 = vector.shape_cast %147 : vector<1x128x128xbf16> to vector<128x128xbf16>
    %cst_89 = arith.constant dense<0.000000e+00> : vector<16x128xf32>
    %149 = tpu.matmul %146, %148, %cst_89 {dimension_numbers = #tpu.dot_dimension_numbers<[1], [0], [0], [1], [0, 0, 1, 1], [], []>} : vector<16x128xbf16>, vector<128x128xbf16>, vector<16x128xf32> -> vector<16x128xf32>
    %150 = arith.addf %145, %149 : vector<16x128xf32>
    %c0_90 = arith.constant 0 : index
    %c0_91 = arith.constant 0 : index
    %151 = vector.load %arg12[%c0_90, %c0_91] : memref<1x128xf32, #tpu.memory_space<vmem>>, vector<1x128xf32>
    %152 = vector.broadcast %151 : vector<1x128xf32> to vector<16x128xf32>
    %153 = arith.addf %150, %152 : vector<16x128xf32>
    %cst_92 = arith.constant 0.000000e+00 : f32
    %154 = vector.broadcast %cst_92 : f32 to vector<16x128xf32>
    %155 = arith.maximumf %153, %154 : vector<16x128xf32>
    %156 = arith.addf %155, %85 : vector<16x128xf32>
    %c0_93 = arith.constant 0 : index
    %c0_94 = arith.constant 0 : index
    %157 = vector.load %arg13[%c0_93, %c0_94] : memref<16x128xf32, #tpu.memory_space<vmem>>, vector<16x128xf32>
    tpu.vector_store %arg13[%c0_93, %c0_94], %156 {strides = array<i32>} : memref<16x128xf32, #tpu.memory_space<vmem>>, vector<16x128xf32>,
    return
  }
}

</mosaic_0001>

<bundles_post_ra>
// kernel: tpu_custom_call.1
= control target key start
LH: loop header
LB: loop body
LE: loop exit
PB: predicated region body
PF: predicated region fallthrough
CT: control target
= control target key end

     0   :  { %18 = vsyncpa [#allocation3], 0  ;;  %s2550_s0 = inlined_call_operand.hbm [shape: bf16[16,192], index: 0, kind: input, shape index: {}]   ;;  %s2551_s1 = inlined_call_operand.hbm [shape: bf16[192,128], index: 1, kind: input, shape index: {}]   ;;  %s2552_s2 = inlined_call_operand.vmem [shape: f32[1,128], index: 2, kind: input, shape index: {}]   ;;  %s2553_s3 = inlined_call_operand.hbm [shape: bf16[3,128,128], index: 3, kind: input, shape index: {}]   ;;  %s2554_s4 = inlined_call_operand.vmem [shape: f32[1,128], index: 4, kind: input, shape index: {}]   ;;  %s2555_s5 = inlined_call_operand.hbm [shape: bf16[3,128,128], index: 5, kind: input, shape index: {}]   ;;  %s2556_s6 = inlined_call_operand.vmem [shape: f32[1,128], index: 6, kind: input, shape index: {}]   ;;  %s2557_s7 = inlined_call_operand.hbm [shape: bf16[128,128], index: 7, kind: input, shape index: {}]   ;;  %s2558_s8 = inlined_call_operand.vmem [shape: f32[1,128], index: 8, kind: input, shape index: {}]   ;;  %s2559_s9 = inlined_call_operand.hbm [shape: bf16[3,128,128], index: 9, kind: input, shape index: {}]   ;;  %s2560_s10 = inlined_call_operand.vmem [shape: f32[1,128], index: 10, kind: input, shape index: {}]   ;;  %s2561_s11 = inlined_call_operand.hbm [shape: bf16[3,128,128], index: 11, kind: input, shape index: {}]   ;;  %s2562_s12 = inlined_call_operand.vmem [shape: f32[1,128], index: 12, kind: input, shape index: {}]   ;;  %s2563_s13 = inlined_call_operand.hbm [shape: f32[16,128], index: 13, kind: output, shape index: {}]  }
   0x1   :  { %19 = vsyncpa [#allocation6], 0 }
   0x2   :  { %20 = vsyncpa [#allocation9], 0 }
   0x3   :  { %21 = vsyncpa [#allocation12], 0  ;;  %s40_s27 = sshll.u32 %s2551_s1, 4  ;;  %s41_s27 = int_to_ptr.hbm [resolvable:$true] %s40_s27 }
   0x4   :  { %22 = vsyncpa [#allocation4], 0  ;;  %s2313_s28 = smov [#allocation5]   ;;  %s70_s15 = sshll.u32 %s2555_s5, 4  ;;  %s71_s15 = int_to_ptr.hbm [resolvable:$true] %s70_s15 }
   0x5   :  { %s42_s29 = sshll.u32 %s2313_s28, 4  ;;  %s2314_s16 = smov 64   ;;  %s43_s29 = int_to_ptr.vmem [resolvable:$true] %s42_s29 }
   0x6   :  { %s2315_s17 = smov 4   ;;  %s2316_s18 = smov [#allocation8]  }
   0x7   :  { %48 = dma.hbm_to_vmem [thread:$0]  %s41_s27, 1536, %s43_s29, [#allocation6], %s2314_s16, %s2314_s16, %s2315_s17  }
   0x8   :  { %s72_s19 = sshll.u32 %s2316_s18, 4  ;;  %s100_s21 = sshll.u32 %s2559_s9, 4  ;;  %s73_s19 = int_to_ptr.vmem [resolvable:$true] %s72_s19  ;;  %s101_s21 = int_to_ptr.hbm [resolvable:$true] %s100_s21 }
   0x9   :  { %78 = dma.hbm_to_vmem [thread:$0]  %s71_s15, 3072, %s73_s19, [#allocation9], %s2314_s16, %s2314_s16, %s2315_s17  }
   0xa   :  { %s27_s23 = sshll.u32 %s2550_s0, 4  ;;  %s2317_s24 = smov [#allocation11]   ;;  %s28_s23 = int_to_ptr.hbm [resolvable:$true] %s27_s23 }
   0xb   :  { %s102_s25 = sshll.u32 %s2317_s24, 4  ;;  %s2318_s26 = smov [#allocation2]   ;;  %s103_s25 = int_to_ptr.vmem [resolvable:$true] %s102_s25 }
   0xc   :  { %108 = dma.hbm_to_vmem [thread:$0]  %s101_s21, 3072, %s103_s25, [#allocation12], %s2314_s16, %s2314_s16, %s2315_s17  }
   0xd   :  { %s29_s9 = sshll.u32 %s2318_s26, 4  ;;  %s2319_s27 = smov 128   ;;  %s30_s9 = int_to_ptr.vmem [resolvable:$true] %s29_s9 }
   0xe   :  { %s2320_s28 = smov 8   ;;  %s55_s0 = sshll.u32 %s2553_s3, 4  ;;  %s56_s0 = int_to_ptr.hbm [resolvable:$true] %s55_s0 }
   0xf   :  { %35 = dma.hbm_to_vmem [thread:$0]  %s28_s23, 256, %s30_s9, [#allocation3], %s2319_s27, %s2319_s27, %s2320_s28  }
  0x10   :  { %s2321_s14 = smov [#allocation7]   ;;  %s85_s20 = sshll.u32 %s2557_s7, 4  ;;  %s86_s20 = int_to_ptr.hbm [resolvable:$true] %s85_s20 }
  0x11   :  { %s57_s15 = sshll.u32 %s2321_s14, 4  ;;  %s2322_s1 = smov [#allocation10]   ;;  %s58_s15 = int_to_ptr.vmem [resolvable:$true] %s57_s15 }
  0x12   :  { %63 = dma.hbm_to_vmem [thread:$0]  %s56_s0, 3072, %s58_s15, [#allocation6], %s2314_s16, %s2314_s16, %s2315_s17  }
  0x13   :  { %s87_s21 = sshll.u32 %s2322_s1, 4  ;;  %s115_s23 = sshll.u32 %s2561_s11, 4  ;;  %s88_s21 = int_to_ptr.vmem [resolvable:$true] %s87_s21  ;;  %s116_s23 = int_to_ptr.hbm [resolvable:$true] %s115_s23 }
  0x14   :  { %93 = dma.hbm_to_vmem [thread:$0]  %s86_s20, 1024, %s88_s21, [#allocation9], %s2314_s16, %s2314_s16, %s2315_s17  }
  0x15   :  { %s2323_s3 = smov [#allocation13]  }
  0x16   :  { %s117_s24 = sshll.u32 %s2323_s3, 4  ;;  %s118_s24 = int_to_ptr.vmem [resolvable:$true] %s117_s24 }
  0x17   :  { %123 = dma.hbm_to_vmem [thread:$0]  %s116_s23, 3072, %s118_s24, [#allocation12], %s2314_s16, %s2314_s16, %s2315_s17  }
  0x18   :  { %2303 = dma.done.wait [#allocation3], 256  }
  0x19   :  { %2304 = vsyncadd [#allocation3], 4294967040 }
  0x1a   :  { %2305 = dma.done.wait [#allocation6], 4608  }
  0x1b   :  { %2306 = vsyncadd [#allocation6], 4294962688 }
  0x1c   :  { %2307 = dma.done.wait [#allocation9], 4096  }
  0x1d   :  { %2308 = vsyncadd [#allocation9], 4294963200 }
  0x1e   :  { %2309 = dma.done.wait [#allocation12], 6144  }
  0x1f   :  { %2310 = vsyncadd [#allocation12], 4294961152  ;;  %v1984_v0 = vld [vmem:[#allocation5 + $0x38] sm:$0xff]  ;;  %v1983_v2 = vld [vmem:[#allocation5 + $0x30] sm:$0xff]  ;;  %vm266_vm0 = vcmask 523264   ;;  %v298_v51 = vlaneseq  ;;  %s2324_s29 = smov [#allocation14]  }
  0x20   :  { %v1988_v1 = vld [vmem:[#allocation5 + $0x58] sm:$0xff]  ;;  %270 = vmatpush.bf16.msra.mxu0 %v1984_v0  ;;  %v1987_v3 = vld [vmem:[#allocation5 + $0x50] sm:$0xff]  ;;  %v1982_v5 = vld [vmem:[#allocation5 + $0x28] sm:$0xff]  ;;  %s1460_s30 = sshll.u32 %s2324_s29, 4  ;;  %s1462_s15 = sshll.u32 %s2563_s13, 4  ;;  %s1461_s30 = int_to_ptr.vmem [resolvable:$true] %s1460_s30  ;;  %s1463_s15 = int_to_ptr.hbm [resolvable:$true] %s1462_s15 }
  0x21   :  { %288 = vmatpush.bf16.msra.mxu1 %v1988_v1  ;;  %v1996_v4 = vld [vmem:[#allocation10 + $0x38] sm:$0xff]  ;;  %v1986_v7 = vld [vmem:[#allocation5 + $0x48] sm:$0xff]  ;;  %v1995_v8 = vld [vmem:[#allocation10 + $0x30] sm:$0xff]  ;;  %v2440_v55 = vshrl.u32 %v298_v51, 7 }
  0x22   :  { %v2012_v6 = vld [vmem:[#allocation7 + $0x78] sm:$0xff]  ;;  %372 = vmatpush.bf16.msra.mxu2 %v1996_v4  ;;  %v1981_v9 = vld [vmem:[#allocation5 + $0x20] sm:$0xff]  ;;  %v2011_v10 = vld [vmem:[#allocation7 + $0x70] sm:$0xff] }
  0x23   :  { %495 = vmatpush.bf16.msra.mxu3 %v2012_v6  ;;  %v1985_v11 = vld [vmem:[#allocation5 + $0x40] sm:$0xff]  ;;  %v1975_v12 = vld [vmem:[#allocation2 + $0x4] sm:$0xf]  ;;  %v1482_v13 = vld [vmem:[#allocation2 + $0x8] sm:$0xf0]  ;;  %v300_v57 = vadd.s32 8, %v2440_v55 }
  0x24   :  { %271 = vmatpush.bf16.msra.mxu0 %v1983_v2  ;;  %v1994_v14 = vld [vmem:[#allocation10 + $0x28] sm:$0xff]  ;;  %v2004_v15 = vld [vmem:[#allocation7 + $0x38] sm:$0xff]  ;;  %v1485_v17 = vor.u32 %v1975_v12, %v1482_v13  ;;  %v2003_v18 = vld [vmem:[#allocation7 + $0x30] sm:$0xff]  ;;  %v2444_v58 = vand.u32 7, %v2440_v55  ;;  %vm418_vm1 = vcmp.lt.s32.totalorder %v2440_v55, 1  ;;  %vm388_vm3 = vcmp.lt.s32.totalorder %v2440_v55, 2 }
  0x25   :  { %289 = vmatpush.bf16.msra.mxu1 %v1987_v3  ;;  %v1980_v16 = vld [vmem:[#allocation5 + $0x18] sm:$0xff]  ;;  %v1979_v19 = vld [vmem:[#allocation5 + $0x10] sm:$0xff]  ;;  %v1978_v20 = vld [vmem:[#allocation5 + $0x8] sm:$0xff]  ;;  %v2446_v61 = vand.u32 7, %v300_v57  ;;  %vm925_vm9 = vcmp.lt.s32.totalorder %v2440_v55, 4 }
  0x26   :  { %373 = vmatpush.bf16.msra.mxu2 %v1995_v8  ;;  %v1977_v21 = vld [vmem:[#allocation5] sm:$0xff]  ;;  %v1480_v22 = vld [vmem:[#allocation2] sm:$0xf]  ;;  %v1976_v23 = vld [vmem:[#allocation2 + $0x4] sm:$0xf0]  ;;  %vm421_vm2 = vcmp.ge.s32.totalorder %v2444_v58, 1 }
  0x27   :  { %496 = vmatpush.bf16.msra.mxu3 %v2011_v10  ;;  %v2020_v24 = vld [vmem:[#allocation7 + $0xb8] sm:$0xff]  ;;  %v1481_v25 = vor.u32 %v1976_v23, %v1480_v22  ;;  %v2019_v26 = vld [vmem:[#allocation7 + $0xb0] sm:$0xff]  ;;  %v2018_v27 = vld [vmem:[#allocation7 + $0xa8] sm:$0xff]  ;;  %vm422_vm4 = vcmp.ge.s32.totalorder %v2446_v61, 1  ;;  %vm391_vm5 = vcmp.ge.s32.totalorder %v2444_v58, 2  ;;  %vm392_vm6 = vcmp.ge.s32.totalorder %v2446_v61, 2 }
  0x28   :  { %272 = vmatpush.bf16.msra.mxu0 %v1982_v5  ;;  %v2010_v28 = vld [vmem:[#allocation7 + $0x68] sm:$0xff]  ;;  %v1993_v30 = vld [vmem:[#allocation10 + $0x20] sm:$0xff]  ;;  %v1992_v34 = vld [vmem:[#allocation10 + $0x18] sm:$0xff]  ;;  %vm928_vm10 = vcmp.ge.s32.totalorder %v2444_v58, 4  ;;  %vm929_vm11 = vcmp.ge.s32.totalorder %v2446_v61, 4 }
  0x29   :  { %290 = vmatpush.bf16.msra.mxu1 %v1986_v7  ;;  %v2002_v29 = vld [vmem:[#allocation7 + $0x28] sm:$0xff]  ;;  %v2017_v31 = vld [vmem:[#allocation7 + $0xa0] sm:$0xff]  ;;  %v2016_v35 = vld [vmem:[#allocation7 + $0x98] sm:$0xff] }
  0x2a   :  { %374 = vmatpush.bf16.msra.mxu2 %v1994_v14  ;;  %v2009_v32 = vld [vmem:[#allocation7 + $0x60] sm:$0xff]  ;;  %v2008_v36 = vld [vmem:[#allocation7 + $0x58] sm:$0xff]  ;;  %v1991_v38 = vld [vmem:[#allocation10 + $0x10] sm:$0xff] }
  0x2b   :  { %497 = vmatpush.bf16.msra.mxu3 %v2010_v28  ;;  %v2001_v33 = vld [vmem:[#allocation7 + $0x20] sm:$0xff]  ;;  %v2000_v37 = vld [vmem:[#allocation7 + $0x18] sm:$0xff]  ;;  %v2015_v39 = vld [vmem:[#allocation7 + $0x90] sm:$0xff] }
  0x2c   :  { %273 = vmatpush.bf16.msra.mxu0 %v1981_v9  ;;  %v2007_v40 = vld [vmem:[#allocation7 + $0x50] sm:$0xff]  ;;  %v1990_v42 = vld [vmem:[#allocation10 + $0x8] sm:$0xff]  ;;  %v1989_v46 = vld [vmem:[#allocation10] sm:$0xff] }
  0x2d   :  { %291 = vmatpush.bf16.msra.mxu1 %v1985_v11  ;;  %v1999_v41 = vld [vmem:[#allocation7 + $0x10] sm:$0xff]  ;;  %v2014_v43 = vld [vmem:[#allocation7 + $0x88] sm:$0xff]  ;;  %v2013_v47 = vld [vmem:[#allocation7 + $0x80] sm:$0xff] }
  0x2e   :  { %375 = vmatpush.bf16.msra.mxu2 %v1993_v30  ;;  %v2006_v44 = vld [vmem:[#allocation7 + $0x48] sm:$0xff]  ;;  %v2005_v48 = vld [vmem:[#allocation7 + $0x40] sm:$0xff]  ;;  %v2044_v50 = vld [vmem:[#allocation8 + $0xb8] sm:$0xff] }
  0x2f   :  { %498 = vmatpush.bf16.msra.mxu3 %v2009_v32  ;;  %v1998_v45 = vld [vmem:[#allocation7 + $0x8] sm:$0xff]  ;;  %v1997_v49 = vld [vmem:[#allocation7] sm:$0xff]  ;;  %v2105_v53 = vld [vmem:[%s2552_s2] ss:$0 sm:$0xff] }
  0x30   :  { %274 = vmatpush.bf16.msra.mxu0 %v1980_v16  ;;  %1534 = vmatmul.msk.bf16.vlgmr.msra.gmra.mxu1 %vm266_vm0, %v1485_v17  ;;  %vm2458_vm7 = vmpackc.low %vm422_vm4, %vm421_vm2  ;;  %v2036_v14 = vld [vmem:[#allocation8 + $0x78] sm:$0xff]  ;;  %v2043_v16 = vld [vmem:[#allocation8 + $0xb0] sm:$0xff] }
  0x31   :  { %557 = vmatpush.bf16.msrb.mxu1 %v2004_v15  ;;  %vm2466_vm8 = vmpackc.low %vm392_vm6, %vm391_vm5  ;;  %v2028_v15 = vld [vmem:[#allocation8 + $0x38] sm:$0xff]  ;;  %v2035_v17 = vld [vmem:[#allocation8 + $0x70] sm:$0xff] }
  0x32   :  { %376 = vmatpush.bf16.msra.mxu2 %v1992_v34  ;;  %v2041_v22 = vld [vmem:[#allocation8 + $0xa0] sm:$0xff]  ;;  %v2039_v28 = vld [vmem:[#allocation8 + $0x90] sm:$0xff]  ;;  %v2030_v32 = vld [vmem:[#allocation8 + $0x48] sm:$0xff] }
  0x33   :  { %499 = vmatpush.bf16.msra.mxu3 %v2008_v36  ;;  %v2033_v23 = vld [vmem:[#allocation8 + $0x60] sm:$0xff]  ;;  %v2023_v30 = vld [vmem:[#allocation8 + $0x10] sm:$0xff]  ;;  %vm2516_vm12 = vmpackc.low %vm929_vm11, %vm928_vm10 }
  0x34   :  { %275 = vmatpush.bf16.msra.mxu0 %v1979_v19  ;;  %v2042_v19 = vld [vmem:[#allocation8 + $0xa8] sm:$0xff]  ;;  %v2037_v34 = vld [vmem:[#allocation8 + $0x80] sm:$0xff] }
  0x35   :  { %558 = vmatpush.bf16.msrb.mxu1 %v2003_v18  ;;  %v2027_v18 = vld [vmem:[#allocation8 + $0x30] sm:$0xff]  ;;  %v2021_v36 = vld [vmem:[#allocation8] sm:$0xff] }
  0x36   :  { %377 = vmatpush.bf16.msra.mxu2 %v1991_v38  ;;  %v2057_v8 = vld [vmem:[#allocation11 + $0x60] sm:$0xff] }
  0x37   :  { %500 = vmatpush.bf16.msra.mxu3 %v2007_v40 }
  0x38   :  { %276 = vmatpush.bf16.msra.mxu0 %v1978_v20  ;;  %v2034_v20 = vld [vmem:[#allocation8 + $0x68] sm:$0xff] }
  0x39   :  { %559 = vmatpush.bf16.msrb.mxu1 %v2002_v29  ;;  %v2031_v29 = vld [vmem:[#allocation8 + $0x50] sm:$0xff] }
  0x3a   :  { %378 = vmatpush.bf16.msra.mxu2 %v1990_v42 }
  0x3b   :  { %501 = vmatpush.bf16.msra.mxu3 %v2006_v44 }
  0x3c   :  { %277 = vmatpush.bf16.msra.mxu0 %v1977_v21  ;;  %v2026_v21 = vld [vmem:[#allocation8 + $0x28] sm:$0xff] }
  0x3d   :  { %560 = vmatpush.bf16.msrb.mxu1 %v2001_v33  ;;  %v2022_v33 = vld [vmem:[#allocation8 + $0x8] sm:$0xff] }
  0x3e   :  { %379 = vmatpush.bf16.msra.mxu2 %v1989_v46 }
  0x3f   :  { %278 = vmatmul.bf16.vlgmr.msra.gmra.mxu0 %v1481_v25  ;;  %502 = vmatpush.bf16.msra.mxu3 %v2005_v48  ;;  %v2040_v25 = vld [vmem:[#allocation8 + $0x98] sm:$0xff] }
  0x40   :  { %636 = vmatpush.bf16.msrb.mxu0 %v2020_v24  ;;  %v2025_v24 = vld [vmem:[#allocation8 + $0x20] sm:$0xff] }
  0x41   :  { %561 = vmatpush.bf16.msrb.mxu1 %v2000_v37  ;;  %v2068_v37 = vld [vmem:[#allocation11 + $0xb8] sm:$0xff] }
  0x42   :  { %755 = vmatpush.bf16.msrb.mxu2 %v2036_v14  ;;  %v2049_v14 = vld [vmem:[#allocation11 + $0x20] sm:$0xff] }
  0x43   :  { %817 = vmatpush.bf16.msrb.mxu3 %v2028_v15  ;;  %v2064_v15 = vld [vmem:[#allocation11 + $0x98] sm:$0xff] }
  0x44   :  { %637 = vmatpush.bf16.msrb.mxu0 %v2019_v26  ;;  %v2032_v26 = vld [vmem:[#allocation8 + $0x58] sm:$0xff] }
  0x45   :  { %562 = vmatpush.bf16.msrb.mxu1 %v1999_v41 }
  0x46   :  { %756 = vmatpush.bf16.msrb.mxu2 %v2035_v17  ;;  %v2048_v17 = vld [vmem:[#allocation11 + $0x18] sm:$0xff] }
  0x47   :  { %818 = vmatpush.bf16.msrb.mxu3 %v2027_v18  ;;  %v2063_v18 = vld [vmem:[#allocation11 + $0x90] sm:$0xff] }
  0x48   :  { %638 = vmatpush.bf16.msrb.mxu0 %v2018_v27  ;;  %v2024_v27 = vld [vmem:[#allocation8 + $0x18] sm:$0xff] }
  0x49   :  { %563 = vmatpush.bf16.msrb.mxu1 %v1998_v45 }
  0x4a   :  { %757 = vmatpush.bf16.msrb.mxu2 %v2034_v20  ;;  %v2047_v20 = vld [vmem:[#allocation11 + $0x10] sm:$0xff] }
  0x4b   :  { %819 = vmatpush.bf16.msrb.mxu3 %v2026_v21  ;;  %v2062_v21 = vld [vmem:[#allocation11 + $0x88] sm:$0xff] }
  0x4c   :  { %639 = vmatpush.bf16.msrb.mxu0 %v2017_v31  ;;  %v2038_v31 = vld [vmem:[#allocation8 + $0x88] sm:$0xff] }
  0x4d   :  { %564 = vmatpush.bf16.msrb.mxu1 %v1997_v49 }
  0x4e   :  { %758 = vmatpush.bf16.msrb.mxu2 %v2033_v23  ;;  %v2054_v23 = vld [vmem:[#allocation11 + $0x48] sm:$0xff] }
  0x4f   :  { %820 = vmatpush.bf16.msrb.mxu3 %v2025_v24  ;;  %v2046_v24 = vld [vmem:[#allocation11 + $0x8] sm:$0xff] }
  0x50   :  { %640 = vmatpush.bf16.msrb.mxu0 %v2016_v35  ;;  %v2029_v35 = vld [vmem:[#allocation8 + $0x40] sm:$0xff] }
  0x51   :  { %897 = vmatpush.bf16.msra.mxu1 %v2044_v50 }
  0x52   :  { %759 = vmatpush.bf16.msrb.mxu2 %v2032_v26  ;;  %v2053_v26 = vld [vmem:[#allocation11 + $0x40] sm:$0xff] }
  0x53   :  { %821 = vmatpush.bf16.msrb.mxu3 %v2024_v27  ;;  %v2045_v27 = vld [vmem:[#allocation11] sm:$0xff] }
  0x54   :  { %641 = vmatpush.bf16.msrb.mxu0 %v2015_v39 }
  0x55   :  { %898 = vmatpush.bf16.msra.mxu1 %v2043_v16  ;;  %v2056_v16 = vld [vmem:[#allocation11 + $0x58] sm:$0xff] }
  0x56   :  { %760 = vmatpush.bf16.msrb.mxu2 %v2031_v29  ;;  %v2092_v29 = vld [vmem:[#allocation13 + $0xb8] sm:$0xff] }
  0x57   :  { %822 = vmatpush.bf16.msrb.mxu3 %v2023_v30  ;;  %v2084_v30 = vld [vmem:[#allocation13 + $0x78] sm:$0xff] }
  0x58   :  { %642 = vmatpush.bf16.msrb.mxu0 %v2014_v43  ;;  %v2107_v43 = vld [vmem:[%s2554_s4] ss:$0 sm:$0xff] }
  0x59   :  { %899 = vmatpush.bf16.msra.mxu1 %v2042_v19  ;;  %v2055_v19 = vld [vmem:[#allocation11 + $0x50] sm:$0xff] }
  0x5a   :  { %761 = vmatpush.bf16.msrb.mxu2 %v2030_v32  ;;  %v2091_v32 = vld [vmem:[#allocation13 + $0xb0] sm:$0xff] }
  0x5b   :  { %823 = vmatpush.bf16.msrb.mxu3 %v2022_v33 }
  0x5c   :  { %643 = vmatpush.bf16.msrb.mxu0 %v2013_v47 }
  0x5d   :  { %900 = vmatpush.bf16.msra.mxu1 %v2041_v22 }
  0x5e   :  { %762 = vmatpush.bf16.msrb.mxu2 %v2029_v35 }
  0x5f   :  { %824 = vmatpush.bf16.msrb.mxu3 %v2021_v36 }
  0x61   :  { %901 = vmatpush.bf16.msra.mxu1 %v2040_v25  ;;  %v2061_v25 = vld [vmem:[#allocation11 + $0x80] sm:$0xff] }
  0x65   :  { %902 = vmatpush.bf16.msra.mxu1 %v2039_v28 }
  0x69   :  { %903 = vmatpush.bf16.msra.mxu1 %v2038_v31  ;;  %v2076_v31 = vld [vmem:[#allocation13 + $0x38] sm:$0xff] }
  0x6d   :  { %904 = vmatpush.bf16.msra.mxu1 %v2037_v34 }
  0xad   :  { %v293_v52 = vpop.f32.mrf.mxu1 }
  0xb5   :  { %v295_v63 = vpop.f32.mrf.mxu1 }
  0xbc   :  { %v279_v54 = vpop.f32.mrf.mxu0 }
  0xbd   :  { %v280_v56 = vadd.f32 %v2105_v53, %v279_v54 }
  0xbf   :  { %v294_v59 = vadd.f32 %v293_v52, %v280_v56 }
  0xc1   :  { %v386_v1 = vrot.slane %v294_v59, 6  ;;  %v416_v2 = vrot.slane %v294_v59, 7 }
  0xc4   :  { %v281_v60 = vpop.f32.mrf.mxu0 }
  0xc5   :  { %v282_v62 = vadd.f32 %v2105_v53, %v281_v60 }
  0xc7   :  { %v296_v0 = vadd.f32 %v295_v63, %v282_v62 }
  0xc9   :  { %v387_v3 = vrot.slane %v296_v0, 6  ;;  %v417_v4 = vrot.slane %v296_v0, 7  ;;  %v303_v5 = vpack.c.bf16 %v296_v0, %v294_v59 }
  0xcb   :  { %380 = vmatmul.bf16.vlgmr.msra.gmra.mxu2 %v303_v5  ;;  %644 = vmatmul.bf16.vlgmr.msrb.gmra.mxu0 %v303_v5  ;;  %v419_v6 = vsel %vm418_vm1, %v416_v2, %v417_v4  ;;  %v420_v7 = vsel %vm418_vm1, %v417_v4, %v416_v2  ;;  %v389_v9 = vsel %vm388_vm3, %v386_v1, %v387_v3  ;;  %v2052_v4 = vld [vmem:[#allocation11 + $0x38] sm:$0xff]  ;;  %v2067_v5 = vld [vmem:[#allocation11 + $0xb0] sm:$0xff] }
  0xcc   :  { %v1600_v10 = vpack.c.bf16 %v419_v6, %v420_v7  ;;  %v390_v11 = vsel %vm388_vm3, %v387_v3, %v386_v1  ;;  %v2060_v3 = vld [vmem:[#allocation11 + $0x78] sm:$0xff]  ;;  %1087 = vmatpush.bf16.msra.mxu2 %v2052_v4  ;;  %v2059_v6 = vld [vmem:[#allocation11 + $0x70] sm:$0xff]  ;;  %v2090_v4 = vld [vmem:[#allocation13 + $0xa8] sm:$0xff] }
  0xcd   :  { %v1635_v13 = vpack.c.bf16 %v389_v9, %v390_v11  ;;  %1025 = vmatpush.bf16.msra.mxu0 %v2060_v3  ;;  %v2051_v7 = vld [vmem:[#allocation11 + $0x30] sm:$0xff]  ;;  %v2066_v9 = vld [vmem:[#allocation11 + $0xa8] sm:$0xff] }
  0xce   :  { %1601 = vmatmul.msk.bf16.vlgmr.msra.gmra.mxu3 %vm2458_vm7, %v1600_v10  ;;  %v2058_v10 = vld [vmem:[#allocation11 + $0x68] sm:$0xff]  ;;  %v2075_v3 = vld [vmem:[#allocation13 + $0x30] sm:$0xff] }
  0xcf   :  { %1636 = vmatmul.msk.bf16.vlgmr.msrb.gmra.mxu1 %vm2466_vm8, %v1635_v13  ;;  %1167 = vmatpush.bf16.msra.mxu3 %v2068_v37  ;;  %v2050_v11 = vld [vmem:[#allocation11 + $0x28] sm:$0xff]  ;;  %v2065_v13 = vld [vmem:[#allocation11 + $0xa0] sm:$0xff]  ;;  %v2108_v37 = vld [vmem:[%s2556_s6] ss:$0 sm:$0xff] }
  0xd0   :  { %1088 = vmatpush.bf16.msra.mxu2 %v2051_v7  ;;  %1286 = vmatpush.bf16.msrb.mxu1 %v2084_v30  ;;  %v2089_v7 = vld [vmem:[#allocation13 + $0xa0] sm:$0xff] }
  0xd1   :  { %1026 = vmatpush.bf16.msra.mxu0 %v2059_v6  ;;  %v2074_v6 = vld [vmem:[#allocation13 + $0x28] sm:$0xff] }
  0xd3   :  { %1168 = vmatpush.bf16.msra.mxu3 %v2067_v5  ;;  %v2082_v5 = vld [vmem:[#allocation13 + $0x68] sm:$0xff] }
  0xd4   :  { %1089 = vmatpush.bf16.msra.mxu2 %v2050_v11  ;;  %v2088_v11 = vld [vmem:[#allocation13 + $0x98] sm:$0xff] }
  0xd5   :  { %1027 = vmatpush.bf16.msra.mxu0 %v2058_v10  ;;  %v2073_v10 = vld [vmem:[#allocation13 + $0x20] sm:$0xff] }
  0xd7   :  { %1169 = vmatpush.bf16.msra.mxu3 %v2066_v9  ;;  %v2081_v9 = vld [vmem:[#allocation13 + $0x60] sm:$0xff] }
  0xd8   :  { %1090 = vmatpush.bf16.msra.mxu2 %v2049_v14  ;;  %v2087_v14 = vld [vmem:[#allocation13 + $0x90] sm:$0xff] }
  0xd9   :  { %1028 = vmatpush.bf16.msra.mxu0 %v2057_v8  ;;  %v2072_v8 = vld [vmem:[#allocation13 + $0x18] sm:$0xff] }
  0xdb   :  { %1170 = vmatpush.bf16.msra.mxu3 %v2065_v13  ;;  %v2080_v13 = vld [vmem:[#allocation13 + $0x58] sm:$0xff] }
  0xdc   :  { %1091 = vmatpush.bf16.msra.mxu2 %v2048_v17  ;;  %v2086_v17 = vld [vmem:[#allocation13 + $0x88] sm:$0xff] }
  0xdd   :  { %1029 = vmatpush.bf16.msra.mxu0 %v2056_v16  ;;  %v2071_v16 = vld [vmem:[#allocation13 + $0x10] sm:$0xff] }
  0xdf   :  { %1171 = vmatpush.bf16.msra.mxu3 %v2064_v15  ;;  %v2079_v15 = vld [vmem:[#allocation13 + $0x50] sm:$0xff] }
  0xe0   :  { %1092 = vmatpush.bf16.msra.mxu2 %v2047_v20  ;;  %v2085_v20 = vld [vmem:[#allocation13 + $0x80] sm:$0xff] }
  0xe1   :  { %1030 = vmatpush.bf16.msra.mxu0 %v2055_v19  ;;  %v2070_v19 = vld [vmem:[#allocation13 + $0x8] sm:$0xff] }
  0xe3   :  { %1172 = vmatpush.bf16.msra.mxu3 %v2063_v18  ;;  %v2078_v18 = vld [vmem:[#allocation13 + $0x48] sm:$0xff] }
  0xe4   :  { %1093 = vmatpush.bf16.msra.mxu2 %v2046_v24 }
  0xe5   :  { %1031 = vmatpush.bf16.msra.mxu0 %v2054_v23 }
  0xe7   :  { %1173 = vmatpush.bf16.msra.mxu3 %v2062_v21  ;;  %v2077_v21 = vld [vmem:[#allocation13 + $0x40] sm:$0xff] }
  0xe8   :  { %1094 = vmatpush.bf16.msra.mxu2 %v2045_v27 }
  0xe9   :  { %1032 = vmatpush.bf16.msra.mxu0 %v2053_v26 }
  0xeb   :  { %1174 = vmatpush.bf16.msra.mxu3 %v2061_v25 }
  0xed   :  { %1348 = vmatpush.bf16.msrb.mxu0 %v2076_v31 }
  0xf1   :  { %1349 = vmatpush.bf16.msrb.mxu0 %v2075_v3 }
  0xf5   :  { %1350 = vmatpush.bf16.msrb.mxu0 %v2074_v6 }
  0xf9   :  { %1351 = vmatpush.bf16.msrb.mxu0 %v2073_v10 }
  0xfd   :  { %1352 = vmatpush.bf16.msrb.mxu0 %v2072_v8 }
 0x101   :  { %1353 = vmatpush.bf16.msrb.mxu0 %v2071_v16 }
 0x105   :  { %1354 = vmatpush.bf16.msrb.mxu0 %v2070_v19 }
 0x148   :  { %v645_v39 = vpop.f32.mrf.mxu0 }
 0x14c   :  { %v566_v38 = vpop.f32.mrf.mxu1 }
 0x14e   :  { %v381_v22 = vpop.f32.mrf.mxu2 }
 0x150   :  { %v647_v48 = vpop.f32.mrf.mxu0 }
 0x151   :  { %v504_v40 = vpop.f32.mrf.mxu3 }
 0x152   :  { %v567_v41 = vadd.f32 %v566_v38, %v504_v40  ;;  %v2106_v40 = vld [vmem:[%s2558_s8] ss:$0 sm:$0xff] }
 0x154   :  { %v650_v42 = vadd.f32 %v645_v39, %v567_v41  ;;  %v568_v45 = vpop.f32.mrf.mxu1 }
 0x156   :  { %v656_v44 = vadd.f32 %v2107_v43, %v650_v42  ;;  %v383_v28 = vpop.f32.mrf.mxu2 }
 0x158   :  { %v658_v50 = vmax.f32 %v656_v44, 0.0 }
 0x159   :  { %v506_v46 = vpop.f32.mrf.mxu3 }
 0x15a   :  { %v569_v47 = vadd.f32 %v568_v45, %v506_v46  ;;  %v660_v53 = vrot.slane %v658_v50, 6  ;;  %v683_v54 = vrot.slane %v658_v50, 7 }
 0x15c   :  { %v651_v49 = vadd.f32 %v647_v48, %v569_v47  ;;  %v382_v47 = vadd.f32 %v2106_v40, %v381_v22  ;;  %v2069_v22 = vld [vmem:[#allocation13] sm:$0xff] }
 0x15d   :  { %1355 = vmatpush.bf16.msrb.mxu0 %v2069_v22 }
 0x15e   :  { %v657_v51 = vadd.f32 %v2107_v43, %v651_v49 }
 0x160   :  { %v659_v52 = vmax.f32 %v657_v51, 0.0 }
 0x162   :  { %v661_v56 = vrot.slane %v659_v52, 6  ;;  %v684_v57 = vrot.slane %v659_v52, 7  ;;  %v831_v59 = vpack.c.bf16 %v659_v52, %v658_v50  ;;  %v384_v50 = vadd.f32 %v2106_v40, %v383_v28  ;;  %v2109_v28 = vld [vmem:[%s2560_s10] ss:$0 sm:$0xff] }
 0x164   :  { %905 = vmatmul.bf16.vlgmr.msra.gmra.mxu1 %v831_v59  ;;  %v685_v60 = vsel %vm418_vm1, %v683_v54, %v684_v57  ;;  %v686_v62 = vsel %vm418_vm1, %v684_v57, %v683_v54  ;;  %v662_v63 = vsel %vm388_vm3, %v660_v53, %v661_v56  ;;  %v663_v0 = vsel %vm388_vm3, %v661_v56, %v660_v53 }
 0x165   :  { %v1702_v1 = vpack.c.bf16 %v685_v60, %v686_v62  ;;  %v1737_v2 = vpack.c.bf16 %v662_v63, %v663_v0 }
 0x167   :  { %1703 = vmatmul.msk.bf16.vlgmr.msrb.gmra.mxu2 %vm2458_vm7, %v1702_v1  ;;  %1738 = vmatmul.msk.bf16.vlgmr.msrb.gmra.mxu3 %vm2466_vm8, %v1737_v2  ;;  %v2083_v2 = vld [vmem:[#allocation13 + $0x70] sm:$0xff] }
 0x168   :  { %1428 = vmatpush.bf16.msrb.mxu2 %v2092_v29  ;;  %1287 = vmatpush.bf16.msrb.mxu1 %v2083_v2 }
 0x16c   :  { %1429 = vmatpush.bf16.msrb.mxu2 %v2091_v32  ;;  %1288 = vmatpush.bf16.msrb.mxu1 %v2082_v5 }
 0x170   :  { %1430 = vmatpush.bf16.msrb.mxu2 %v2090_v4  ;;  %1289 = vmatpush.bf16.msrb.mxu1 %v2081_v9 }
 0x174   :  { %1431 = vmatpush.bf16.msrb.mxu2 %v2089_v7  ;;  %1290 = vmatpush.bf16.msrb.mxu1 %v2080_v13 }
 0x178   :  { %1432 = vmatpush.bf16.msrb.mxu2 %v2088_v11  ;;  %1291 = vmatpush.bf16.msrb.mxu1 %v2079_v15 }
 0x17c   :  { %1433 = vmatpush.bf16.msrb.mxu2 %v2087_v14  ;;  %1292 = vmatpush.bf16.msrb.mxu1 %v2078_v18 }
 0x180   :  { %1434 = vmatpush.bf16.msrb.mxu2 %v2086_v17  ;;  %1293 = vmatpush.bf16.msrb.mxu1 %v2077_v21 }
 0x184   :  { %1435 = vmatpush.bf16.msrb.mxu2 %v2085_v20 }
 0x1e1   :  { %v906_v33 = vpop.f32.mrf.mxu1 }
 0x1e9   :  { %v908_v44 = vpop.f32.mrf.mxu1 }
 0x1ea   :  { %v764_v34 = vpop.f32.mrf.mxu2  ;;  %v826_v35 = vpop.f32.mrf.mxu3 }
 0x1eb   :  { %v827_v36 = vadd.f32 %v826_v35, %v764_v34 }
 0x1ed   :  { %v911_v38 = vadd.f32 %v906_v33, %v827_v36 }
 0x1ef   :  { %v917_v39 = vadd.f32 %v2108_v37, %v911_v38 }
 0x1f1   :  { %v919_v45 = vmax.f32 %v917_v39, 0.0 }
 0x1f2   :  { %v766_v41 = vpop.f32.mrf.mxu2  ;;  %v828_v42 = vpop.f32.mrf.mxu3 }
 0x1f3   :  { %v829_v43 = vadd.f32 %v828_v42, %v766_v41  ;;  %v2495_v49 = vadd.f32 %v919_v45, %v382_v47 }
 0x1f5   :  { %v912_v46 = vadd.f32 %v908_v44, %v829_v43  ;;  %v923_v53 = vrot.slane %v2495_v49, 4  ;;  %v953_v54 = vrot.slane %v2495_v49, 6 }
 0x1f7   :  { %v918_v48 = vadd.f32 %v2108_v37, %v912_v46 }
 0x1f9   :  { %v920_v51 = vmax.f32 %v918_v48, 0.0 }
 0x1fb   :  { %v2497_v52 = vadd.f32 %v920_v51, %v384_v50 }
 0x1fd   :  { %v924_v56 = vrot.slane %v2497_v52, 4  ;;  %v954_v57 = vrot.slane %v2497_v52, 6  ;;  %v1101_v59 = vpack.c.bf16 %v2497_v52, %v2495_v49 }
 0x1ff   :  { %1175 = vmatmul.bf16.vlgmr.msra.gmra.mxu3 %v1101_v59  ;;  %v955_v60 = vsel %vm388_vm3, %v953_v54, %v954_v57  ;;  %v956_v62 = vsel %vm388_vm3, %v954_v57, %v953_v54  ;;  %v926_v58 = vsel %vm925_vm9, %v923_v53, %v924_v56  ;;  %v927_v61 = vsel %vm925_vm9, %v924_v56, %v923_v53  ;;  %v2110_v54 = vld [vmem:[%s2562_s12] ss:$0 sm:$0xff] }
 0x200   :  { %v1804_v0 = vpack.c.bf16 %v955_v60, %v956_v62  ;;  %v1839_v1 = vpack.c.bf16 %v926_v58, %v927_v61 }
 0x202   :  { %1805 = vmatmul.msk.bf16.vlgmr.msra.gmra.mxu0 %vm2466_vm8, %v1804_v0  ;;  %1840 = vmatmul.msk.bf16.vlgmr.msra.gmra.mxu2 %vm2516_vm12, %v1839_v1 }
 0x27f   :  { %v1034_v23 = vpop.f32.mrf.mxu0 }
 0x282   :  { %v1176_v24 = vpop.f32.mrf.mxu3 }
 0x285   :  { %v1096_v25 = vpop.f32.mrf.mxu2 }
 0x286   :  { %v1097_v26 = vadd.f32 %v1096_v25, %v1034_v23 }
 0x287   :  { %v1036_v30 = vpop.f32.mrf.mxu0 }
 0x288   :  { %v1181_v27 = vadd.f32 %v1176_v24, %v1097_v26 }
 0x28a   :  { %v1187_v29 = vadd.f32 %v2109_v28, %v1181_v27  ;;  %v1178_v33 = vpop.f32.mrf.mxu3 }
 0x28c   :  { %v1189_v35 = vmax.f32 %v1187_v29, 0.0 }
 0x28d   :  { %v1098_v31 = vpop.f32.mrf.mxu2 }
 0x28e   :  { %v1099_v32 = vadd.f32 %v1098_v31, %v1036_v30  ;;  %v1191_v38 = vrot.slane %v1189_v35, 4  ;;  %v1214_v39 = vrot.slane %v1189_v35, 6 }
 0x290   :  { %v1182_v34 = vadd.f32 %v1178_v33, %v1099_v32 }
 0x292   :  { %v1188_v36 = vadd.f32 %v2109_v28, %v1182_v34 }
 0x294   :  { %v1190_v37 = vmax.f32 %v1188_v36, 0.0 }
 0x296   :  { %v1192_v40 = vrot.slane %v1190_v37, 4  ;;  %v1215_v41 = vrot.slane %v1190_v37, 6  ;;  %v1362_v42 = vpack.c.bf16 %v1190_v37, %v1189_v35 }
 0x298   :  { %1436 = vmatmul.bf16.vlgmr.msrb.gmra.mxu2 %v1362_v42  ;;  %v1216_v43 = vsel %vm388_vm3, %v1214_v39, %v1215_v41  ;;  %v1217_v44 = vsel %vm388_vm3, %v1215_v41, %v1214_v39  ;;  %v1193_v45 = vsel %vm925_vm9, %v1191_v38, %v1192_v40  ;;  %v1194_v46 = vsel %vm925_vm9, %v1192_v40, %v1191_v38 }
 0x299   :  { %v1906_v47 = vpack.c.bf16 %v1216_v43, %v1217_v44  ;;  %v1941_v48 = vpack.c.bf16 %v1193_v45, %v1194_v46 }
 0x29b   :  { %1907 = vmatmul.msk.bf16.vlgmr.msrb.gmra.mxu1 %vm2466_vm8, %v1906_v47  ;;  %1942 = vmatmul.msk.bf16.vlgmr.msrb.gmra.mxu0 %vm2516_vm12, %v1941_v48 }
 0x318   :  { %v1295_v50 = vpop.f32.mrf.mxu1  ;;  %v1357_v51 = vpop.f32.mrf.mxu0 }
 0x319   :  { %v1358_v53 = vadd.f32 %v1357_v51, %v1295_v50 }
 0x31b   :  { %v1437_v56 = vpop.f32.mrf.mxu2 }
 0x31c   :  { %v1442_v57 = vadd.f32 %v1437_v56, %v1358_v53 }
 0x31e   :  { %v1448_v59 = vadd.f32 %v2110_v54, %v1442_v57 }
 0x320   :  { %v1450_v55 = vmax.f32 %v1448_v59, 0.0  ;;  %v1297_v60 = vpop.f32.mrf.mxu1  ;;  %v1359_v62 = vpop.f32.mrf.mxu0 }
 0x321   :  { %v1360_v58 = vadd.f32 %v1359_v62, %v1297_v60 }
 0x322   :  { %v1452_v12 = vadd.f32 %v1450_v55, %v2495_v49 }
 0x323   :  { %v1439_v61 = vpop.f32.mrf.mxu2 }
 0x324   :  { %1454 = vst [vmem:[#allocation14] sm:$0xff] %v1452_v12  ;;  %v1443_v63 = vadd.f32 %v1439_v61, %v1360_v58 }
 0x326   :  { %v1449_v0 = vadd.f32 %v2110_v54, %v1443_v63 }
 0x328   :  { %v1451_v1 = vmax.f32 %v1449_v0, 0.0 }
 0x32a   :  { %v1453_v2 = vadd.f32 %v1451_v1, %v2497_v52 }
 0x32c   :  { %1455 = vst [vmem:[#allocation14 + $0x8] sm:$0xff] %v1453_v2 }
 0x32d   :  { %1468 = dma.vmem_to_hbm [thread:$0]  %s1461_s30, 256, %s1463_s15, [#allocation4], %s2319_s27, %s2319_s27, %s2320_s28  }
 0x32e   :  { %2311 = dma.done.wait [#allocation4], 256  }
 0x32f   :  { %2312 = vsyncadd [#allocation4], 4294967040 }
 0x330   :  { %1473 = vsyncpa [#allocation3], 1 }
 0x331   :  { %1474 = vsyncpa [#allocation6], 1 }
 0x332   :  { %1475 = vsyncpa [#allocation9], 1 }
 0x333   :  { %1476 = vsyncpa [#allocation12], 1 }
 0x334   :  { %1477 = vsyncpa [#allocation4], 1 }

</bundles_post_ra>
